<compile_context>
chip_gen: v6e
topology: v6e:2x2x1
jax: 0.10.0
libtpu: 0.0.40
codegen_flags: <defaults>
</compile_context>

<pallas_src>
import math
from functools import partial

import jax
import jax.numpy as jnp
from jax.experimental import pallas as pl
from jax.experimental.pallas import tpu as pltpu

EMBED = 72
MLP_DIM = 288


def _erf(x):
    # Abramowitz & Stegun 7.1.26 rational approximation, |error| <= 1.5e-7.
    # Uses only abs / div / exp / mul / add / where, all of which lower in Mosaic.
    a1, a2, a3, a4, a5 = (0.254829592, -0.284496736, 1.421413741,
                          -1.453152027, 1.061405429)
    p = 0.3275911
    ax = jnp.abs(x)
    t = 1.0 / (1.0 + p * ax)
    poly = ((((a5 * t + a4) * t + a3) * t + a2) * t + a1) * t
    y = 1.0 - poly * jnp.exp(-ax * ax)
    return jnp.where(x < 0, -y, y)


def _gelu_exact(x):
    # Exact GELU: 0.5 * x * (1 + erf(x / sqrt(2))) — PyTorch F.gelu default.
    return 0.5 * x * (1.0 + _erf(x * 0.7071067811865476))


def _mlp_kernel(x_ref, w1t_ref, b1_ref, w2t_ref, b2_ref, out_ref):
    # x_ref: (rows, EMBED) tile.  Weights are already transposed to (in, out),
    # so both matmuls feed the MXU directly with no in-kernel transpose.
    x = x_ref[...]
    h = jnp.dot(x, w1t_ref[...], preferred_element_type=jnp.float32) + b1_ref[...]
    h = _gelu_exact(h)                      # dropout == identity (eval mode)
    y = jnp.dot(h, w2t_ref[...], preferred_element_type=jnp.float32) + b2_ref[...]
    out_ref[...] = y.astype(out_ref.dtype)  # dropout == identity (eval mode)


def prepare_mlp_params(w1, b1, w2, b2):
    """One-time host-side layout prep (do NOT redo this per forward call).

    w1: (MLP_DIM, EMBED), w2: (EMBED, MLP_DIM) in PyTorch Linear convention.
    """
    assert w1.shape == (MLP_DIM, EMBED) and w2.shape == (EMBED, MLP_DIM)
    return {
        "w1t": jnp.asarray(w1).T,                 # (EMBED, MLP_DIM)
        "b1": jnp.asarray(b1).reshape(1, MLP_DIM),
        "w2t": jnp.asarray(w2).T,                 # (MLP_DIM, EMBED)
        "b2": jnp.asarray(b2).reshape(1, EMBED),
    }


def _pick_block_rows(n_rows):
    """Row-tile size: single step for small inputs; otherwise >=2 steps so
    both v7x TensorCores get work, capped at 1024 rows (well under VMEM on
    v5e/v6e/v7x), multiple of 8 sublanes for f32."""
    if n_rows <= 512:
        return n_rows
    rows = min(1024, pl.cdiv(n_rows, 2))
    return ((rows + 7) // 8) * 8


@jax.jit
def mlp_forward(x, params):
    """x: (..., EMBED) float32 -> (..., EMBED). params from prepare_mlp_params."""
    orig_shape = x.shape
    assert orig_shape[-1] == EMBED
    n_rows = math.prod(orig_shape[:-1]) if len(orig_shape) > 1 else 1
    x2 = x.reshape(n_rows, EMBED)

    block_rows = _pick_block_rows(n_rows)
    grid = (pl.cdiv(n_rows, block_rows),)

    flops = 4 * n_rows * EMBED * MLP_DIM                       # two matmuls
    bytes_accessed = 4 * (2 * n_rows * EMBED                    # x in + y out
                          + 2 * EMBED * MLP_DIM                 # both weights
                          + EMBED + MLP_DIM)                    # biases

    out2 = pl.pallas_call(
        _mlp_kernel,
        out_shape=jax.ShapeDtypeStruct((n_rows, EMBED), x.dtype),
        grid_spec=pltpu.PrefetchScalarGridSpec(
            num_scalar_prefetch=0,
            grid=grid,
            in_specs=[
                # x row tile (lane dim 72 == full array dim, so no (8,128) issue).
                pl.BlockSpec((block_rows, EMBED), lambda i: (i, 0)),
                # Invariant operands (same block every step).
                # (pipeline_mode=pl.Buffered(1) would single-buffer these; kept
                #  default for maximum compile portability — the win is tiny.)
                pl.BlockSpec((EMBED, MLP_DIM), lambda i: (0, 0)),   # W1.T
                pl.BlockSpec((1, MLP_DIM), lambda i: (0, 0)),       # b1
                pl.BlockSpec((MLP_DIM, EMBED), lambda i: (0, 0)),   # W2.T
                pl.BlockSpec((1, EMBED), lambda i: (0, 0)),         # b2
            ],
            out_specs=pl.BlockSpec((block_rows, EMBED), lambda i: (i, 0)),
        ),
        compiler_params=pltpu.CompilerParams(
            dimension_semantics=("parallel",)),
        cost_estimate=pl.CostEstimate(
            flops=flops,
            transcendentals=n_rows * MLP_DIM,   # one exp per hidden element
            bytes_accessed=bytes_accessed),
    )(x2, params["w1t"], params["b1"], params["w2t"], params["b2"])

    return out2.reshape(orig_shape)


def _init_mlp_params(key):
    """Mimics the PyTorch module's _init_weights: xavier_uniform weights,
    normal(std=1e-6) biases."""
    k1, k2, k3, k4 = jax.random.split(key, 4)

    def xavier(k, out_f, in_f):
        bound = math.sqrt(6.0 / (in_f + out_f))
        return jax.random.uniform(k, (out_f, in_f), minval=-bound, maxval=bound,
                                  dtype=jnp.float32)

    w1 = xavier(k1, MLP_DIM, EMBED)
    w2 = xavier(k2, EMBED, MLP_DIM)
    b1 = 1e-6 * jax.random.normal(k3, (MLP_DIM,), dtype=jnp.float32)
    b2 = 1e-6 * jax.random.normal(k4, (EMBED,), dtype=jnp.float32)
    return w1, b1, w2, b2


if __name__ == "__main__":
    key = jax.random.PRNGKey(0)
    kx, kp = jax.random.split(key)

    B, S = 2, 8
    x = jax.random.normal(kx, (B, S, EMBED), dtype=jnp.float32)
    w1, b1, w2, b2 = _init_mlp_params(kp)

    params = prepare_mlp_params(w1, b1, w2, b2)     # one-time layout prep
    out = mlp_forward(x, params)
    jax.block_until_ready(out)

    # Pure-JAX reference with the same semantics as the PyTorch module in eval
    # mode: exact (erf) GELU, dropout == identity.
    def ref(x):
        h = x @ w1.T + b1
        h = jax.nn.gelu(h, approximate=False)
        return h @ w2.T + b2

    ref_out = ref(x)
    assert out.shape == (B, S, EMBED)
    assert jnp.allclose(out, ref_out, atol=2e-4, rtol=2e-4), \
        float(jnp.max(jnp.abs(out - ref_out)))

    print("KERNEL_OK")
</pallas_src>

<mosaic_0001>
module attributes {stable_mosaic.version = 11 : i64} {
  func.func @_mlp_kernel(%arg0: i32, %arg1: memref<16x72xf32, #tpu.memory_space<vmem>>, %arg2: memref<72x288xf32, #tpu.memory_space<vmem>>, %arg3: memref<1x288xf32, #tpu.memory_space<vmem>>, %arg4: memref<288x72xf32, #tpu.memory_space<vmem>>, %arg5: memref<1x72xf32, #tpu.memory_space<vmem>>, %arg6: memref<16x72xf32, #tpu.memory_space<vmem>>) attributes {dimension_semantics = [#tpu.dimension_semantics<parallel>], iteration_bounds = array<i64: 1>, scalar_prefetch = 0 : i64, scratch_operands = 0 : i64, tpu.core_type = #tpu.core_type<tc>, window_params = [{transform_indices = @transform_0, window_bounds = array<i64: 16, 72>}, {pipeline_mode = #tpu.pipeline_mode<synchronous>, transform_indices = @transform_1, window_bounds = array<i64: 72, 288>}, {pipeline_mode = #tpu.pipeline_mode<synchronous>, transform_indices = @transform_2, window_bounds = array<i64: 1, 288>}, {pipeline_mode = #tpu.pipeline_mode<synchronous>, transform_indices = @transform_3, window_bounds = array<i64: 288, 72>}, {pipeline_mode = #tpu.pipeline_mode<synchronous>, transform_indices = @transform_4, window_bounds = array<i64: 1, 72>}, {transform_indices = @transform_5, window_bounds = array<i64: 16, 72>}]} {
    %c0 = arith.constant 0 : index
    %c0_0 = arith.constant 0 : index
    %0 = vector.load %arg1[%c0, %c0_0] : memref<16x72xf32, #tpu.memory_space<vmem>>, vector<16x72xf32>
    %c0_1 = arith.constant 0 : index
    %c0_2 = arith.constant 0 : index
    %1 = vector.load %arg2[%c0_1, %c0_2] : memref<72x288xf32, #tpu.memory_space<vmem>>, vector<72x288xf32>
    %cst = arith.constant dense<0.000000e+00> : vector<16x288xf32>
    %2 = tpu.matmul %0, %1, %cst {dimension_numbers = #tpu.dot_dimension_numbers<[1], [0], [0], [1], [0, 0, 1, 1], [], []>} : vector<16x72xf32>, vector<72x288xf32>, vector<16x288xf32> -> vector<16x288xf32>
    %c0_3 = arith.constant 0 : index
    %c0_4 = arith.constant 0 : index
    %3 = vector.load %arg3[%c0_3, %c0_4] : memref<1x288xf32, #tpu.memory_space<vmem>>, vector<1x288xf32>
    %4 = vector.broadcast %3 : vector<1x288xf32> to vector<16x288xf32>
    %5 = arith.addf %2, %4 : vector<16x288xf32>
    %cst_5 = arith.constant 5.000000e-01 : f32
    %6 = vector.broadcast %cst_5 : f32 to vector<16x288xf32>
    %7 = arith.mulf %6, %5 : vector<16x288xf32>
    %cst_6 = arith.constant 0.707106769 : f32
    %8 = vector.broadcast %cst_6 : f32 to vector<16x288xf32>
    %9 = arith.mulf %5, %8 : vector<16x288xf32>
    %10 = math.absf %9 : vector<16x288xf32>
    %cst_7 = arith.constant 0.327591091 : f32
    %11 = vector.broadcast %cst_7 : f32 to vector<16x288xf32>
    %12 = arith.mulf %11, %10 : vector<16x288xf32>
    %cst_8 = arith.constant 1.000000e+00 : f32
    %13 = vector.broadcast %cst_8 : f32 to vector<16x288xf32>
    %14 = arith.addf %13, %12 : vector<16x288xf32>
    %cst_9 = arith.constant 1.000000e+00 : f32
    %15 = vector.broadcast %cst_9 : f32 to vector<16x288xf32>
    %16 = arith.divf %15, %14 : vector<16x288xf32>
    %cst_10 = arith.constant 1.06140542 : f32
    %17 = vector.broadcast %cst_10 : f32 to vector<16x288xf32>
    %18 = arith.mulf %17, %16 : vector<16x288xf32>
    %cst_11 = arith.constant -1.45315206 : f32
    %19 = vector.broadcast %cst_11 : f32 to vector<16x288xf32>
    %20 = arith.addf %18, %19 : vector<16x288xf32>
    %21 = arith.mulf %20, %16 : vector<16x288xf32>
    %cst_12 = arith.constant 1.42141378 : f32
    %22 = vector.broadcast %cst_12 : f32 to vector<16x288xf32>
    %23 = arith.addf %21, %22 : vector<16x288xf32>
    %24 = arith.mulf %23, %16 : vector<16x288xf32>
    %cst_13 = arith.constant -0.284496725 : f32
    %25 = vector.broadcast %cst_13 : f32 to vector<16x288xf32>
    %26 = arith.addf %24, %25 : vector<16x288xf32>
    %27 = arith.mulf %26, %16 : vector<16x288xf32>
    %cst_14 = arith.constant 0.254829586 : f32
    %28 = vector.broadcast %cst_14 : f32 to vector<16x288xf32>
    %29 = arith.addf %27, %28 : vector<16x288xf32>
    %30 = arith.mulf %29, %16 : vector<16x288xf32>
    %cst_15 = arith.constant 0.000000e+00 : f32
    %31 = vector.broadcast %cst_15 : f32 to vector<16x288xf32>
    %32 = arith.subf %31, %10 : vector<16x288xf32>
    %33 = arith.mulf %32, %10 : vector<16x288xf32>
    %34 = math.exp %33 : vector<16x288xf32>
    %35 = arith.mulf %30, %34 : vector<16x288xf32>
    %cst_16 = arith.constant 1.000000e+00 : f32
    %36 = vector.broadcast %cst_16 : f32 to vector<16x288xf32>
    %37 = arith.subf %36, %35 : vector<16x288xf32>
    %cst_17 = arith.constant 0.000000e+00 : f32
    %38 = vector.broadcast %cst_17 : f32 to vector<16x288xf32>
    %39 = arith.cmpf olt, %9, %38 : vector<16x288xf32>
    %cst_18 = arith.constant 0.000000e+00 : f32
    %40 = vector.broadcast %cst_18 : f32 to vector<16x288xf32>
    %41 = arith.subf %40, %37 : vector<16x288xf32>
    %42 = arith.select %39, %41, %37 : vector<16x288xi1>, vector<16x288xf32>
    %cst_19 = arith.constant 1.000000e+00 : f32
    %43 = vector.broadcast %cst_19 : f32 to vector<16x288xf32>
    %44 = arith.addf %43, %42 : vector<16x288xf32>
    %45 = arith.mulf %7, %44 : vector<16x288xf32>
    %c0_20 = arith.constant 0 : index
    %c0_21 = arith.constant 0 : index
    %46 = vector.load %arg4[%c0_20, %c0_21] : memref<288x72xf32, #tpu.memory_space<vmem>>, vector<288x72xf32>
    %cst_22 = arith.constant dense<0.000000e+00> : vector<16x72xf32>
    %47 = tpu.matmul %45, %46, %cst_22 {dimension_numbers = #tpu.dot_dimension_numbers<[1], [0], [0], [1], [0, 0, 1, 1], [], []>} : vector<16x288xf32>, vector<288x72xf32>, vector<16x72xf32> -> vector<16x72xf32>
    %c0_23 = arith.constant 0 : index
    %c0_24 = arith.constant 0 : index
    %48 = vector.load %arg5[%c0_23, %c0_24] : memref<1x72xf32, #tpu.memory_space<vmem>>, vector<1x72xf32>
    %49 = vector.broadcast %48 : vector<1x72xf32> to vector<16x72xf32>
    %50 = arith.addf %47, %49 : vector<16x72xf32>
    %c0_25 = arith.constant 0 : index
    %c0_26 = arith.constant 0 : index
    %51 = vector.load %arg6[%c0_25, %c0_26] : memref<16x72xf32, #tpu.memory_space<vmem>>, vector<16x72xf32>
    tpu.vector_store %arg6[%c0_25, %c0_26], %50 {strides = array<i32>} : memref<16x72xf32, #tpu.memory_space<vmem>>, vector<16x72xf32>,
    return
  }
  func.func @transform_0(%arg0: i32) -> (i32, i32) {
    %c0_i32 = arith.constant 0 : i32
    %c0_i32_0 = arith.constant 0 : i32
    return %arg0, %c0_i32 : i32, i32
  }
  func.func @transform_1(%arg0: i32) -> (i32, i32) {
    %c0_i32 = arith.constant 0 : i32
    %c0_i32_0 = arith.constant 0 : i32
    %c0_i32_1 = arith.constant 0 : i32
    return %c0_i32, %c0_i32_0 : i32, i32
  }
  func.func @transform_2(%arg0: i32) -> (i32, i32) {
    %c0_i32 = arith.constant 0 : i32
    %c0_i32_0 = arith.constant 0 : i32
    %c0_i32_1 = arith.constant 0 : i32
    return %c0_i32, %c0_i32_0 : i32, i32
  }
  func.func @transform_3(%arg0: i32) -> (i32, i32) {
    %c0_i32 = arith.constant 0 : i32
    %c0_i32_0 = arith.constant 0 : i32
    %c0_i32_1 = arith.constant 0 : i32
    return %c0_i32, %c0_i32_0 : i32, i32
  }
  func.func @transform_4(%arg0: i32) -> (i32, i32) {
    %c0_i32 = arith.constant 0 : i32
    %c0_i32_0 = arith.constant 0 : i32
    %c0_i32_1 = arith.constant 0 : i32
    return %c0_i32, %c0_i32_0 : i32, i32
  }
  func.func @transform_5(%arg0: i32) -> (i32, i32) {
    %c0_i32 = arith.constant 0 : i32
    %c0_i32_0 = arith.constant 0 : i32
    return %arg0, %c0_i32 : i32, i32
  }
}

</mosaic_0001>

<bundles_post_ra>
// kernel: mlp_forward.1
= control target key start
LH: loop header
LB: loop body
LE: loop exit
PB: predicated region body
PF: predicated region fallthrough
CT: control target
= control target key end

     0   :  { %v750_v4 = vmov 0.0   ;;  %s1060_s0 = inlined_call_operand.vmem [shape: f32[16,72], index: 0, kind: input, shape index: {}]   ;;  %s1061_s1 = inlined_call_operand.vmem [shape: f32[72,288], index: 1, kind: input, shape index: {}]   ;;  %s1062_s2 = inlined_call_operand.vmem [shape: f32[1,288], index: 2, kind: input, shape index: {}]   ;;  %s1063_s3 = inlined_call_operand.vmem [shape: f32[288,72], index: 3, kind: input, shape index: {}]   ;;  %s1064_s4 = inlined_call_operand.vmem [shape: f32[1,72], index: 4, kind: input, shape index: {}]   ;;  %s1065_s5 = inlined_call_operand.hbm [shape: f32[16,72], index: 5, kind: output, shape index: {}]  }
   0x1   :  { %v48_v0 = vld [vmem:[%s1061_s1 + $0xc8] sm:$0xff]  ;;  %v47_v1 = vld [vmem:[%s1061_s1 + $0xc0] sm:$0xff]  ;;  %v45_v2 = vld [vmem:[%s1061_s1 + $0xb0] sm:$0xff]  ;;  %138 = vmatprep.mubr.f32.mxu1 %v750_v4 }
   0x2   :  { %88 = vmatprep.subr.mxu1 %v48_v0  ;;  %v44_v3 = vld [vmem:[%s1061_s1 + $0xa8] sm:$0xff]  ;;  %v42_v5 = vld [vmem:[%s1061_s1 + $0x98] sm:$0xff]  ;;  %v41_v6 = vld [vmem:[%s1061_s1 + $0x90] sm:$0xff] }
   0x3   :  { %89 = vmatpush1.msra.mxu1 %v47_v1  ;;  %v39_v7 = vld [vmem:[%s1061_s1 + $0x80] sm:$0xff]  ;;  %v38_v8 = vld [vmem:[%s1061_s1 + $0x78] sm:$0xff]  ;;  %v36_v9 = vld [vmem:[%s1061_s1 + $0x68] sm:$0xff] }
   0x4   :  { %90 = vmatprep.subr.mxu1 %v45_v2  ;;  %v35_v10 = vld [vmem:[%s1061_s1 + $0x60] sm:$0xff]  ;;  %v33_v11 = vld [vmem:[%s1061_s1 + $0x50] sm:$0xff]  ;;  %v32_v12 = vld [vmem:[%s1061_s1 + $0x48] sm:$0xff] }
   0x5   :  { %91 = vmatpush1.msra.mxu1 %v44_v3  ;;  %v30_v13 = vld [vmem:[%s1061_s1 + $0x38] sm:$0xff] }
   0x6   :  { %92 = vmatprep.subr.mxu1 %v42_v5 }
   0x7   :  { %93 = vmatpush1.msra.mxu1 %v41_v6 }
   0x8   :  { %94 = vmatprep.subr.mxu1 %v39_v7 }
   0x9   :  { %95 = vmatpush1.msra.mxu1 %v38_v8 }
   0xa   :  { %96 = vmatprep.subr.mxu1 %v36_v9 }
   0xb   :  { %97 = vmatpush1.msra.mxu1 %v35_v10 }
   0xc   :  { %10 = vsyncpa [#allocation3], 0  ;;  %98 = vmatprep.subr.mxu1 %v33_v11  ;;  %v29_v14 = vld [vmem:[%s1061_s1 + $0x30] sm:$0xff]  ;;  %v27_v15 = vld [vmem:[%s1061_s1 + $0x20] sm:$0xff]  ;;  %vm67_vm0 = vcmask 588800   ;;  %v52_v63 = vlaneseq  ;;  %vm431_vm7 = vcmask 261120  }
   0xd   :  { %99 = vmatpush1.msra.mxu1 %v32_v12  ;;  %v26_v16 = vld [vmem:[%s1061_s1 + $0x18] sm:$0xff]  ;;  %v24_v17 = vld [vmem:[%s1061_s1 + $0x8] sm:$0xff]  ;;  %v23_v18 = vld [vmem:[%s1061_s1] sm:$0xff]  ;;  %s751_s18 = smov [#allocation2]  }
   0xe   :  { %100 = vmatprep.subr.mxu1 %v30_v13  ;;  %v21_v19 = vld [vmem:[%s1060_s0] sm:$0xff]  ;;  %v49_v20 = vld [vmem:[%s1061_s1 + $0xd0] sm:$0xff]  ;;  %v46_v21 = vld [vmem:[%s1061_s1 + $0xb8] sm:$0xff]  ;;  %v53_v0 = vshrl.u32 %v52_v63, 7  ;;  %s595_s19 = sshll.u32 %s751_s18, 4  ;;  %s596_s19 = int_to_ptr.vmem [resolvable:$true] %s595_s19 }
   0xf   :  { %101 = vmatpush1.msra.mxu1 %v29_v14  ;;  %v22_v22 = vld [vmem:[%s1060_s0 + $0x8] sm:$0xff]  ;;  %v43_v23 = vld [vmem:[%s1061_s1 + $0xa0] sm:$0xff]  ;;  %v37_v25 = vld [vmem:[%s1061_s1 + $0x70] sm:$0xff]  ;;  %s728_s20 = scalar_lea.vmem %s596_s19, 256  ;;  %p733_p1 = scmp.lt.s32.totalorder %s596_s19, %s596_s19 }
  0x10   :  { %102 = vmatprep.subr.mxu1 %v27_v15  ;;  %v40_v24 = vld [vmem:[%s1061_s1 + $0x88] sm:$0xff]  ;;  %v34_v26 = vld [vmem:[%s1061_s1 + $0x58] sm:$0xff]  ;;  %v31_v27 = vld [vmem:[%s1061_s1 + $0x40] sm:$0xff]  ;;  %v54_v1 = vsub.s32 0, %v53_v0  ;;  %v58_v3 = vsub.s32 1, %v53_v0  ;;  %p729_p0 = scmp.ne.s32.totalorder %s596_s19, %s728_s20  ;;  %p734_p2 = scmp.lt.s32.totalorder %s728_s20, %s728_s20 }
  0x11   :  { %103 = vmatpush1.msra.mxu1 %v26_v16  ;;  %v28_v28 = vld [vmem:[%s1061_s1 + $0x28] sm:$0xff]  ;;  %v25_v29 = vld [vmem:[%s1061_s1 + $0x10] sm:$0xff]  ;;  %v419_v30 = vld [vmem:[%s1063_s3 + $0xf8] sm:$0xff] }
  0x12   :  { %104 = vmatprep.subr.mxu1 %v24_v17  ;;  %624 = vmatprep.subr.mxu0 %v419_v30  ;;  %v403_v31 = vld [vmem:[%s1063_s3 + $0x78] sm:$0xff]  ;;  %v418_v32 = vld [vmem:[%s1063_s3 + $0xf0] sm:$0xff]  ;;  %v417_v34 = vld [vmem:[%s1063_s3 + $0xe8] sm:$0xff]  ;;  %p735_p3 = por %p734_p2, %p733_p1 }
  0x13   :  { %105 = vmatpush1.msra.mxu1 %v23_v18  ;;  %625 = vmatpush3.msra.mxu0 %v403_v31  ;;  %v402_v33 = vld [vmem:[%s1063_s3 + $0x70] sm:$0xff]  ;;  %v401_v35 = vld [vmem:[%s1063_s3 + $0x68] sm:$0xff]  ;;  %v416_v36 = vld [vmem:[%s1063_s3 + $0xe0] sm:$0xff] }
  0x14   :  { %606 = vmatmul.mubr.msk.f32.vlgmr.msra.gmra.mxu1 %vm67_vm0, %v21_v19  ;;  %668 = vmatprep.subr.mxu1 %v49_v20  ;;  %v400_v37 = vld [vmem:[%s1063_s3 + $0x60] sm:$0xff]  ;;  %v415_v38 = vld [vmem:[%s1063_s3 + $0xd8] sm:$0xff]  ;;  %v414_v40 = vld [vmem:[%s1063_s3 + $0xd0] sm:$0xff]  ;;  %p736_p4 = pnand %p735_p3, %p729_p0 }
  0x15   :  { %669 = vmatpush3.msra.mxu1 %v49_v20  ;;  %144 = vmatprep.mubr.f32.mxu1 %v750_v4  ;;  %v399_v39 = vld [vmem:[%s1063_s3 + $0x58] sm:$0xff]  ;;  %v398_v41 = vld [vmem:[%s1063_s3 + $0x50] sm:$0xff]  ;;  %v413_v42 = vld [vmem:[%s1063_s3 + $0xc8] sm:$0xff] }
  0x16   :  { %670 = vmatprep.subr.mxu1 %v46_v21  ;;  %626 = vmatprep.subr.mxu0 %v418_v32  ;;  %v397_v43 = vld [vmem:[%s1063_s3 + $0x48] sm:$0xff]  ;;  %v412_v44 = vld [vmem:[%s1063_s3 + $0xc0] sm:$0xff]  ;;  %v411_v46 = vld [vmem:[%s1063_s3 + $0xb8] sm:$0xff] }
  0x17   :  { %671 = vmatpush3.msra.mxu1 %v46_v21  ;;  %627 = vmatpush3.msra.mxu0 %v402_v33  ;;  %v396_v45 = vld [vmem:[%s1063_s3 + $0x40] sm:$0xff]  ;;  %v395_v47 = vld [vmem:[%s1063_s3 + $0x38] sm:$0xff]  ;;  %v410_v48 = vld [vmem:[%s1063_s3 + $0xb0] sm:$0xff] }
  0x18   :  { %607 = vmatmul.mubr.msk.f32.gmra.mxu1 %vm67_vm0, %v22_v22  ;;  %672 = vmatprep.subr.mxu1 %v43_v23  ;;  %v394_v49 = vld [vmem:[%s1063_s3 + $0x30] sm:$0xff]  ;;  %v409_v50 = vld [vmem:[%s1063_s3 + $0xa8] sm:$0xff]  ;;  %v408_v52 = vld [vmem:[%s1063_s3 + $0xa0] sm:$0xff] }
  0x19   :  { %673 = vmatpush3.msra.mxu1 %v43_v23  ;;  %686 = vmatprep.mubr.msk.f32.mxu1 %vm67_vm0, %v21_v19  ;;  %v393_v51 = vld [vmem:[%s1063_s3 + $0x28] sm:$0xff]  ;;  %v392_v53 = vld [vmem:[%s1063_s3 + $0x20] sm:$0xff]  ;;  %v407_v54 = vld [vmem:[%s1063_s3 + $0x98] sm:$0xff] }
  0x1a   :  { %674 = vmatprep.subr.mxu1 %v40_v24  ;;  %628 = vmatprep.subr.mxu0 %v417_v34  ;;  %v391_v55 = vld [vmem:[%s1063_s3 + $0x18] sm:$0xff]  ;;  %v406_v56 = vld [vmem:[%s1063_s3 + $0x90] sm:$0xff]  ;;  %v405_v58 = vld [vmem:[%s1063_s3 + $0x88] sm:$0xff] }
  0x1b   :  { %675 = vmatpush3.msra.mxu1 %v40_v24  ;;  %629 = vmatpush3.msra.mxu0 %v401_v35  ;;  %v390_v57 = vld [vmem:[%s1063_s3 + $0x10] sm:$0xff]  ;;  %v389_v59 = vld [vmem:[%s1063_s3 + $0x8] sm:$0xff]  ;;  %v404_v60 = vld [vmem:[%s1063_s3 + $0x80] sm:$0xff] }
  0x1c   :  { %676 = vmatprep.subr.mxu1 %v37_v25  ;;  %630 = vmatprep.subr.mxu0 %v416_v36  ;;  %v388_v61 = vld [vmem:[%s1063_s3] sm:$0xff]  ;;  %v974_v62 = vld [vmem:[%s1063_s3 + $0x118] sm:$0xff] }
  0x1d   :  { %677 = vmatpush3.msra.mxu1 %v37_v25  ;;  %631 = vmatpush3.msra.mxu0 %v400_v37  ;;  %v50_v2 = vld [vmem:[%s1062_s2] sm:$0x7]  ;;  %v62_v25 = vsub.s32 2, %v53_v0 }
  0x1e   :  { %678 = vmatprep.subr.mxu1 %v34_v26  ;;  %632 = vmatprep.subr.mxu0 %v415_v38  ;;  %v55_v4 = vrot.slane %v50_v2, %v54_v1  ;;  %v59_v5 = vrot.slane %v50_v2, %v58_v3 }
  0x1f   :  { %679 = vmatpush3.msra.mxu1 %v34_v26  ;;  %633 = vmatpush3.msra.mxu0 %v399_v39  ;;  %v63_v30 = vrot.slane %v50_v2, %v62_v25 }
  0x20   :  { %680 = vmatprep.subr.mxu1 %v31_v27  ;;  %634 = vmatprep.subr.mxu0 %v414_v40 }
  0x21   :  { %681 = vmatpush3.msra.mxu1 %v31_v27  ;;  %635 = vmatpush3.msra.mxu0 %v398_v41 }
  0x22   :  { %682 = vmatprep.subr.mxu1 %v28_v28  ;;  %636 = vmatprep.subr.mxu0 %v413_v42 }
  0x23   :  { %683 = vmatpush3.msra.mxu1 %v28_v28  ;;  %637 = vmatpush3.msra.mxu0 %v397_v43 }
  0x24   :  { %684 = vmatprep.subr.mxu1 %v25_v29  ;;  %638 = vmatprep.subr.mxu0 %v412_v44 }
  0x25   :  { %685 = vmatpush3.msra.mxu1 %v25_v29  ;;  %639 = vmatpush3.msra.mxu0 %v396_v45 }
  0x26   :  { %687 = vmatmul.mubr.msk.f32.vlgmr.msra.gmra.mxu1 %vm67_vm0, %v22_v22  ;;  %640 = vmatprep.subr.mxu0 %v411_v46 }
  0x27   :  { %641 = vmatpush3.msra.mxu0 %v395_v47 }
  0x28   :  { %642 = vmatprep.subr.mxu0 %v410_v48 }
  0x29   :  { %643 = vmatpush3.msra.mxu0 %v394_v49 }
  0x2a   :  { %644 = vmatprep.subr.mxu0 %v409_v50 }
  0x2b   :  { %645 = vmatpush3.msra.mxu0 %v393_v51 }
  0x2c   :  { %646 = vmatprep.subr.mxu0 %v408_v52 }
  0x2d   :  { %647 = vmatpush3.msra.mxu0 %v392_v53 }
  0x2e   :  { %648 = vmatprep.subr.mxu0 %v407_v54 }
  0x2f   :  { %649 = vmatpush3.msra.mxu0 %v391_v55 }
  0x30   :  { %650 = vmatprep.subr.mxu0 %v406_v56 }
  0x31   :  { %651 = vmatpush3.msra.mxu0 %v390_v57 }
  0x32   :  { %652 = vmatprep.subr.mxu0 %v405_v58 }
  0x33   :  { %653 = vmatpush3.msra.mxu0 %v389_v59 }
  0x34   :  { %654 = vmatprep.subr.mxu0 %v404_v60 }
  0x35   :  { %655 = vmatpush3.msra.mxu0 %v388_v61 }
  0x36   :  { %689 = vmatprep.subr.mxu0 %v974_v62 }
  0xd4   :  { %v140_v6 = vpop.f32.mrf.mxu1 }
  0xd5   :  { %v980_v7 = vadd.f32 %v140_v6, %v55_v4 }
  0xd6   :  { %v142_v8 = vpop.f32.mrf.mxu1 }
  0xd7   :  { %v983_v9 = vmul.f32 0.70710677, %v980_v7  ;;  %v985_v10 = vadd.f32 %v142_v8, %v59_v5 }
  0xd8   :  { %v146_v11 = vpop.f32.mrf.mxu1 }
  0xd9   :  { %v238_v12 = vand.u32 2147483647, %v983_v9  ;;  %v989_v13 = vmul.f32 0.70710677, %v985_v10  ;;  %v991_v14 = vadd.f32 %v146_v11, %v55_v4  ;;  %vm358_vm1 = vcmp.lt.f32.partialorder %v983_v9, 0.0 }
  0xda   :  { %v148_v15 = vpop.f32.mrf.mxu1 }
  0xdb   :  { %v244_v16 = vmul.f32 0.3275911, %v238_v12  ;;  %v239_v17 = vand.u32 2147483647, %v989_v13  ;;  %v995_v18 = vmul.f32 0.70710677, %v991_v14  ;;  %v997_v19 = vadd.f32 %v148_v15, %v59_v5 }
  0xdc   :  { %v322_v31 = vsub.f32 0.0, %v238_v12  ;;  %vm359_vm2 = vcmp.lt.f32.partialorder %v989_v13, 0.0 }
  0xdd   :  { %v250_v20 = vadd.f32 1.0, %v244_v16  ;;  %v245_v21 = vmul.f32 0.3275911, %v239_v17  ;;  %v241_v22 = vand.u32 2147483647, %v995_v18  ;;  %v323_v34 = vsub.f32 0.0, %v239_v17 }
  0xde   :  { %v1001_v23 = vmul.f32 0.70710677, %v997_v19  ;;  %v328_v36 = vmul.f32 %v322_v31, %v238_v12  ;;  %vm361_vm3 = vcmp.lt.f32.partialorder %v995_v18, 0.0 }
  0xdf   :  { %704 = vrcp.f32 %v250_v20  ;;  %v251_v24 = vadd.f32 1.0, %v245_v21  ;;  %v247_v26 = vmul.f32 0.3275911, %v241_v22  ;;  %v325_v40 = vsub.f32 0.0, %v241_v22 }
  0xe0   :  { %v242_v27 = vand.u32 2147483647, %v1001_v23  ;;  %v329_v41 = vmul.f32 %v323_v34, %v239_v17  ;;  %v334_v45 = vmul.f32 1.442695, %v328_v36  ;;  %vm362_vm4 = vcmp.lt.f32.partialorder %v1001_v23, 0.0 }
  0xe1   :  { %706 = vrcp.f32 %v251_v24  ;;  %v253_v28 = vadd.f32 1.0, %v247_v26  ;;  %v331_v49 = vmul.f32 %v325_v40, %v241_v22 }
  0xe2   :  { %v248_v29 = vmul.f32 0.3275911, %v242_v27  ;;  %v326_v46 = vsub.f32 0.0, %v242_v27  ;;  %v336_v52 = vmul.f32 1.442695, %v329_v41 }
  0xe3   :  { %708 = vrcp.f32 %v253_v28  ;;  %v340_v60 = vmul.f32 1.442695, %v331_v49 }
  0xe4   :  { %v254_v32 = vadd.f32 1.0, %v248_v29  ;;  %v332_v58 = vmul.f32 %v326_v46, %v242_v27 }
  0xe6   :  { %v688_v33 = vpop.f32.mrf.mxu1  ;;  %710 = vrcp.f32 %v254_v32  ;;  %v342_v5 = vmul.f32 1.442695, %v332_v58 }
  0xe7   :  { %v1004_v35 = vadd.f32 %v688_v33, %v63_v30  ;;  %712 = vpow2.f32 %v334_v45 }
  0xe8   :  { %v217_v37 = vpop.f32.mrf.mxu1 }
  0xe9   :  { %v1007_v38 = vmul.f32 0.70710677, %v1004_v35  ;;  %v1009_v39 = vadd.f32 %v217_v37, %v63_v30 }
  0xeb   :  { %v243_v42 = vand.u32 2147483647, %v1007_v38  ;;  %v1013_v43 = vmul.f32 0.70710677, %v1009_v39  ;;  %vm363_vm5 = vcmp.lt.f32.partialorder %v1007_v38, 0.0 }
  0xec   :  { %v705_v44 = vpop.eup %704 }
  0xed   :  { %v249_v47 = vmul.f32 0.3275911, %v243_v42  ;;  %v240_v48 = vand.u32 2147483647, %v1013_v43  ;;  %v268_v50 = vmul.f32 1.0614054, %v705_v44 }
  0xee   :  { %v707_v51 = vpop.eup %706  ;;  %v327_v15 = vsub.f32 0.0, %v243_v42  ;;  %vm360_vm6 = vcmp.lt.f32.partialorder %v1013_v43, 0.0  ;;  %v610_v43 = vld [vmem:[%s1064_s4] ss:$0 sm:$0xff] }
  0xef   :  { %v255_v53 = vadd.f32 1.0, %v249_v47  ;;  %v246_v54 = vmul.f32 0.3275911, %v240_v48  ;;  %v269_v55 = vmul.f32 1.0614054, %v707_v51  ;;  %v324_v22 = vsub.f32 0.0, %v240_v48 }
  0xf0   :  { %v274_v56 = vadd.f32 -1.4531521, %v268_v50  ;;  %v709_v57 = vpop.eup %708  ;;  %v333_v28 = vmul.f32 %v327_v15, %v243_v42 }
  0xf1   :  { %714 = vrcp.f32 %v255_v53  ;;  %v252_v59 = vadd.f32 1.0, %v246_v54  ;;  %v275_v61 = vadd.f32 -1.4531521, %v269_v55  ;;  %v271_v0 = vmul.f32 1.0614054, %v709_v57 }
  0xf2   :  { %v280_v63 = vmul.f32 %v705_v44, %v274_v56  ;;  %716 = vpow2.f32 %v336_v52  ;;  %v330_v34 = vmul.f32 %v324_v22, %v240_v48  ;;  %v344_v47 = vmul.f32 1.442695, %v333_v28 }
  0xf3   :  { %v711_v1 = vpop.eup %710  ;;  %718 = vrcp.f32 %v252_v59  ;;  %v281_v2 = vmul.f32 %v707_v51, %v275_v61  ;;  %v277_v4 = vadd.f32 -1.4531521, %v271_v0 }
  0xf4   :  { %v286_v3 = vadd.f32 1.4214138, %v280_v63  ;;  %v272_v6 = vmul.f32 1.0614054, %v711_v1  ;;  %720 = vpow2.f32 %v340_v60  ;;  %v713_v33 = vpop.eup %712  ;;  %v338_v56 = vmul.f32 1.442695, %v330_v34 }
  0xf5   :  { %v287_v8 = vadd.f32 1.4214138, %v281_v2  ;;  %v283_v12 = vmul.f32 %v709_v57, %v277_v4  ;;  %722 = vpow2.f32 %v342_v5 }
  0xf6   :  { %v292_v11 = vmul.f32 %v705_v44, %v286_v3  ;;  %v278_v16 = vadd.f32 -1.4531521, %v272_v6  ;;  %724 = vpow2.f32 %v344_v47 }
  0xf7   :  { %v293_v17 = vmul.f32 %v707_v51, %v287_v8  ;;  %v289_v21 = vadd.f32 1.4214138, %v283_v12  ;;  %726 = vpow2.f32 %v338_v56 }
  0xf8   :  { %v298_v20 = vadd.f32 -0.28449672, %v292_v11  ;;  %v284_v24 = vmul.f32 %v711_v1, %v278_v16 }
  0xf9   :  { %v299_v25 = vadd.f32 -0.28449672, %v293_v17  ;;  %v295_v27 = vmul.f32 %v709_v57, %v289_v21  ;;  %v227_v17 = vmul.f32 0.5, %v985_v10 }
  0xfa   :  { %v304_v26 = vmul.f32 %v705_v44, %v298_v20  ;;  %v290_v29 = vadd.f32 1.4214138, %v284_v24 }
  0xfb   :  { %v305_v30 = vmul.f32 %v707_v51, %v299_v25  ;;  %v301_v32 = vadd.f32 -0.28449672, %v295_v27  ;;  %v226_v27 = vmul.f32 0.5, %v980_v7  ;;  %v230_v7 = vmul.f32 0.5, %v997_v19 }
  0xfc   :  { %v310_v31 = vadd.f32 0.2548296, %v304_v26  ;;  %v296_v36 = vmul.f32 %v711_v1, %v290_v29 }
  0xfd   :  { %v311_v40 = vadd.f32 0.2548296, %v305_v30  ;;  %v307_v45 = vmul.f32 %v709_v57, %v301_v32 }
  0xfe   :  { %v1016_v37 = vpop.eup %714  ;;  %v316_v41 = vmul.f32 %v705_v44, %v310_v31  ;;  %v302_v49 = vadd.f32 -0.28449672, %v296_v36  ;;  %v422_v36 = vld [vmem:[%s1063_s3 + $0x110] sm:$0xff] }
  0xff   :  { %v273_v46 = vmul.f32 1.0614054, %v1016_v37  ;;  %v717_v50 = vpop.eup %716  ;;  %v317_v52 = vmul.f32 %v707_v51, %v311_v40  ;;  %v313_v42 = vadd.f32 0.2548296, %v307_v45  ;;  %v229_v45 = vmul.f32 0.5, %v991_v14 }
 0x100   :  { %v346_v53 = vmul.f32 %v713_v33, %v316_v41  ;;  %v1019_v54 = vpop.eup %718  ;;  %v308_v58 = vmul.f32 %v711_v1, %v302_v49 }
 0x101   :  { %v279_v55 = vadd.f32 -1.4531521, %v273_v46  ;;  %v270_v48 = vmul.f32 1.0614054, %v1019_v54  ;;  %v347_v59 = vmul.f32 %v717_v50, %v317_v52  ;;  %v319_v61 = vmul.f32 %v709_v57, %v313_v42  ;;  %v721_v44 = vpop.eup %720  ;;  %v421_v46 = vld [vmem:[%s1063_s3 + $0x108] sm:$0xff] }
 0x102   :  { %v352_v60 = vsub.f32 1.0, %v346_v53  ;;  %v314_v0 = vadd.f32 0.2548296, %v308_v58  ;;  %v723_v8 = vpop.eup %722 }
 0x103   :  { %v285_v63 = vmul.f32 %v1016_v37, %v279_v55  ;;  %v276_v2 = vadd.f32 -1.4531521, %v270_v48  ;;  %v353_v3 = vsub.f32 1.0, %v347_v59  ;;  %v349_v4 = vmul.f32 %v721_v44, %v319_v61  ;;  %v725_v47 = vpop.eup %724 }
 0x104   :  { %v364_v51 = vsub.f32 0.0, %v352_v60  ;;  %v320_v6 = vmul.f32 %v711_v1, %v314_v0  ;;  %v727_v53 = vpop.eup %726  ;;  %v231_v44 = vmul.f32 0.5, %v1004_v35 }
 0x105   :  { %v291_v5 = vadd.f32 1.4214138, %v285_v63  ;;  %v282_v11 = vmul.f32 %v1019_v54, %v276_v2  ;;  %v365_v12 = vsub.f32 0.0, %v353_v3  ;;  %v355_v57 = vsub.f32 1.0, %v349_v4 }
 0x106   :  { %v370_v15 = vsel %vm358_vm1, %v364_v51, %v352_v60  ;;  %v350_v20 = vmul.f32 %v723_v8, %v320_v6  ;;  %v228_v60 = vmul.f32 0.5, %v1009_v39 }
 0x107   :  { %v297_v16 = vmul.f32 %v1016_v37, %v291_v5  ;;  %v288_v21 = vadd.f32 1.4214138, %v282_v11  ;;  %v371_v22 = vsel %vm359_vm2, %v365_v12, %v353_v3  ;;  %v376_v24 = vadd.f32 1.0, %v370_v15 }
 0x108   :  { %v367_v9 = vsub.f32 0.0, %v355_v57  ;;  %v377_v25 = vadd.f32 1.0, %v371_v22  ;;  %v356_v26 = vsub.f32 1.0, %v350_v20 }
 0x109   :  { %v303_v1 = vadd.f32 -0.28449672, %v297_v16  ;;  %v294_v28 = vmul.f32 %v1019_v54, %v288_v21  ;;  %v382_v32 = vmul.f32 %v376_v24, %v226_v27 }
 0x10a   :  { %v373_v29 = vsel %vm361_vm3, %v367_v9, %v355_v57  ;;  %v383_v10 = vmul.f32 %v377_v25, %v227_v17  ;;  %v368_v31 = vsub.f32 0.0, %v356_v26 }
 0x10b   :  { %v309_v30 = vmul.f32 %v1016_v37, %v303_v1  ;;  %v300_v13 = vadd.f32 -0.28449672, %v294_v28  ;;  %v379_v18 = vadd.f32 1.0, %v373_v29 }
 0x10c   :  { %502 = vmatprep.mubr.f32.mxu0 %v383_v10  ;;  %v374_v34 = vsel %vm362_vm4, %v368_v31, %v356_v26 }
 0x10d   :  { %v315_v33 = vadd.f32 0.2548296, %v309_v30  ;;  %v306_v40 = vmul.f32 %v1019_v54, %v300_v13  ;;  %503 = vmatmul.mubr.f32.vlgmr.msra.gmra.mxu0 %v382_v32  ;;  %v380_v41 = vadd.f32 1.0, %v374_v34  ;;  %v385_v19 = vmul.f32 %v379_v18, %v229_v45 }
 0x10e   :  { %690 = vmatpush3.msra.mxu0 %v974_v62  ;;  %v420_v62 = vld [vmem:[%s1063_s3 + $0x100] sm:$0xff] }
 0x10f   :  { %v321_v23 = vmul.f32 %v1016_v37, %v315_v33  ;;  %v312_v49 = vadd.f32 0.2548296, %v306_v40  ;;  %v386_v50 = vmul.f32 %v380_v41, %v230_v7  ;;  %691 = vmatprep.subr.mxu0 %v422_v36 }
 0x110   :  { %692 = vmatpush3.msra.mxu0 %v422_v36 }
 0x111   :  { %v351_v52 = vmul.f32 %v725_v47, %v321_v23  ;;  %v318_v42 = vmul.f32 %v1019_v54, %v312_v49  ;;  %507 = vmatprep.mubr.f32.mxu0 %v386_v50  ;;  %693 = vmatprep.subr.mxu0 %v421_v46 }
 0x112   :  { %508 = vmatmul.mubr.f32.gmra.mxu0 %v385_v19 }
 0x113   :  { %v357_v14 = vsub.f32 1.0, %v351_v52  ;;  %v348_v37 = vmul.f32 %v727_v53, %v318_v42  ;;  %694 = vmatpush3.msra.mxu0 %v421_v46 }
 0x114   :  { %695 = vmatprep.subr.mxu0 %v420_v62 }
 0x115   :  { %v369_v55 = vsub.f32 0.0, %v357_v14  ;;  %v354_v56 = vsub.f32 1.0, %v348_v37  ;;  %696 = vmatpush3.msra.mxu0 %v420_v62 }
 0x117   :  { %v375_v58 = vsel %vm363_vm5, %v369_v55, %v357_v14  ;;  %v366_v48 = vsub.f32 0.0, %v354_v56 }
 0x118   :  { %v381_v54 = vadd.f32 1.0, %v375_v58 }
 0x119   :  { %v372_v59 = vsel %vm360_vm6, %v366_v48, %v354_v56 }
 0x11a   :  { %v378_v61 = vadd.f32 1.0, %v372_v59  ;;  %v387_v0 = vmul.f32 %v381_v54, %v231_v44 }
 0x11c   :  { %v384_v63 = vmul.f32 %v378_v61, %v228_v60 }
 0x11e   :  { %697 = vmatprep.mubr.msk.f32.mxu0 %vm431_vm7, %v384_v63 }
 0x11f   :  { %698 = vmatmul.mubr.msk.f32.vlgmr.msra.gmra.mxu0 %vm431_vm7, %v387_v0 }
 0x1cd   :  { %v656_v2 = vpop.f32.mrf.mxu0 }
 0x1cf   :  { %v657_v38 = vpop.f32.mrf.mxu0 }
 0x1d0   :  { %v658_v5 = vadd.f32 %v657_v38, %v656_v2 }
 0x1d2   :  { %v659_v3 = vpop.f32.mrf.mxu0  ;;  %v505_v8 = vadd.f32 %v658_v5, %v610_v43 }
 0x1d4   :  { %v660_v51 = vpop.f32.mrf.mxu0 }
 0x1d5   :  { %v661_v4 = vadd.f32 %v660_v51, %v659_v3 }
 0x1d7   :  { %v510_v6 = vadd.f32 %v661_v4, %v610_v43 }
 0x1df   :  { %v699_v39 = vpop.f32.mrf.mxu0 }
 0x1e0   :  { %v585_v35 = vadd.f32 %v699_v39, %v510_v6 }
 0x1e1   :  { %v579_v11 = vpop.f32.mrf.mxu0 }
 0x1e2   :  { %589 = vst.msk [vmem:[#allocation2 + $0x8] sm:$0xff] %vm67_vm0, %v585_v35  ;;  %v580_v12 = vadd.f32 %v579_v11, %v505_v8 }
 0x1e4   :  { %588 = vst.msk [vmem:[#allocation2] sm:$0xff] %vm67_vm0, %v580_v12 }
 0x1e5   :  { %739 = shalt.err (!%p736_p4)
}
 0x1e6   :  { %s752_s4 = smov 128   ;;  %s753_s21 = smov 8  }
 0x1e7   :  { %601 = dma.vmem_to_hbm [thread:$0]  %s596_s19, 256, %s1065_s5, [#allocation3], %s752_s4, %s752_s4, %s753_s21  }
 0x1e8   :  { %748 = dma.done.wait [#allocation3], 256  }
 0x1e9   :  { %749 = vsyncadd [#allocation3], 4294967040 }
 0x1ea   :  { %605 = vsyncpa [#allocation3], 1 }

</bundles_post_ra>
